<compile_context>
chip_gen: v5e
topology: v5e:2x2
jax: 0.10.0
libtpu: 0.0.40
codegen_flags: <defaults>
</compile_context>

<pallas_src>
import functools
import math

import jax
import jax.numpy as jnp
from jax import lax
from jax.experimental import pallas as pl
from jax.experimental.pallas import tpu as pltpu


def _focal_term(d, gamma):
    """(1 - pt) ** gamma with integer-gamma special casing (keeps work off EUP)."""
    g = float(gamma)
    if g == 0.0:
        return jnp.ones_like(d)
    if g.is_integer() and 0 < int(g) <= 4:
        out = d
        for _ in range(int(g) - 1):
            out = out * d
        return out
    return jnp.power(jnp.maximum(d, 0.0), g)


# ---------------------------------------------------------------------------
# Primary kernel: pred laid out as (B, C, R, 128) with R = HW // 128.
# ---------------------------------------------------------------------------
def _focal_dense_kernel(pred_ref, label_ref, sum_ref, cnt_ref, *,
                        gamma, ignore_index, num_classes, n_rows,
                        rows_per_tile, tiles_per_split, acc_rows, need_row_mask):
    ci = pl.program_id(1)
    ti = pl.program_id(2)

    @pl.when(ti == 0)
    def _():
        sum_ref[...] = jnp.zeros_like(sum_ref)
        cnt_ref[...] = jnp.zeros_like(cnt_ref)

    labels = label_ref[0]                                  # (S, 128) int32

    # Running max over classes: plain VPU chain over dense (S, 128) vregs.
    m = pred_ref[0, 0].astype(jnp.float32)
    for c in range(1, num_classes):
        m = jnp.maximum(m, pred_ref[0, c].astype(jnp.float32))

    # One pass: softmax denominator + one-hot gather of the labelled logit
    # (compare/select/add -- no dynamic gather, no astype+mul).
    s_exp = jnp.zeros_like(m)
    x_sel = jnp.zeros_like(m)
    for c in range(num_classes):
        xc = pred_ref[0, c].astype(jnp.float32)
        s_exp = s_exp + jnp.exp(xc - m)
        x_sel = x_sel + jnp.where(labels == c, xc, 0.0)

    log_pt = (x_sel - m) - jnp.log(s_exp)                  # (S, 128)

    valid = labels != ignore_index
    if need_row_mask:
        # Only emitted when there is a ragged row tail or a phantom core-split
        # tile; masks garbage rows BEFORE accumulation (keeps NaN/Inf out).
        g = ci * tiles_per_split + ti                      # logical tile id
        row = lax.broadcasted_iota(jnp.int32, labels.shape, 0) + g * rows_per_tile
        valid = valid & (row < n_rows)

    ce = -log_pt
    pt = jnp.exp(log_pt)
    # TODO(synk): per-class alpha weights (alpha=None here) would scale `ce`.
    loss = jnp.where(valid, _focal_term(1.0 - pt, gamma) * ce, 0.0)
    validf = jnp.where(valid, 1.0, 0.0)

    ps, pc = loss, validf
    if rows_per_tile != acc_rows:
        # Fold (S, 128) down to (acc_rows, 128) with tile-aligned static slices.
        ps = loss[0:acc_rows]
        pc = validf[0:acc_rows]
        for q in range(1, rows_per_tile // acc_rows):
            ps = ps + loss[q * acc_rows:(q + 1) * acc_rows]
            pc = pc + validf[q * acc_rows:(q + 1) * acc_rows]

    sum_ref[0] += ps
    cnt_ref[0] += pc


def _focal_dense_call(pred4, mask3, *, gamma, ignore_index, block_bytes):
    b, c, r, _ = (int(d) for d in pred4.shape)

    # Rows per tile from a VMEM byte budget (counted at f32 working size).
    s = (block_bytes // (c * 128 * 4)) // 8 * 8
    s = max(8, min(s, 4096))
    if b == 1 and r >= 16:
        # v7x megacore: with a single batch row make sure there are >= 2 row
        # tiles so both TensorCores get work via the core-split grid axis.
        s = min(s, max(8, ((pl.cdiv(r, 2) + 7) // 8) * 8))
    if s >= r:
        s, n_t = r, 1
    else:
        n_t = pl.cdiv(r, s)

    nsplit = 2 if n_t >= 2 else 1
    tps = pl.cdiv(n_t, nsplit)                 # tiles per core-split
    acc_rows = 8 if s % 8 == 0 else s
    need_row_mask = (nsplit * tps * s != r)    # ragged tail or phantom tiles

    def pred_map(bi, ci, ti):
        g = jnp.minimum(ci * tps + ti, n_t - 1)   # clamp phantom tiles
        return (bi, 0, g, 0)

    def lab_map(bi, ci, ti):
        g = jnp.minimum(ci * tps + ti, n_t - 1)
        return (bi, g, 0)

    def out_map(bi, ci, ti):
        return (bi * nsplit + ci, 0, 0)

    kernel = functools.partial(
        _focal_dense_kernel, gamma=float(gamma), ignore_index=int(ignore_index),
        num_classes=c, n_rows=r, rows_per_tile=s, tiles_per_split=tps,
        acc_rows=acc_rows, need_row_mask=need_row_mask)

    part_sum, part_cnt = pl.pallas_call(
        kernel,
        out_shape=(jax.ShapeDtypeStruct((b * nsplit, acc_rows, 128), jnp.float32),
                   jax.ShapeDtypeStruct((b * nsplit, acc_rows, 128), jnp.float32)),
        grid_spec=pltpu.PrefetchScalarGridSpec(
            num_scalar_prefetch=0,
            grid=(b, nsplit, tps),
            in_specs=[pl.BlockSpec((1, c, s, 128), pred_map),
                      pl.BlockSpec((1, s, 128), lab_map)],
            out_specs=(pl.BlockSpec((1, acc_rows, 128), out_map),
                       pl.BlockSpec((1, acc_rows, 128), out_map))),
        compiler_params=pltpu.CompilerParams(
            dimension_semantics=("parallel", "parallel", "arbitrary"),
            vmem_limit_bytes=32 * 1024 * 1024),
    )(pred4, mask3)
    return jnp.sum(part_sum), jnp.sum(part_cnt)


# ---------------------------------------------------------------------------
# Fallback kernel for ragged HW (HW % 128 != 0): previous verified (B, C, HW)
# layout, class on sublanes, spatial on lanes.  Correctness path only.
# ---------------------------------------------------------------------------
def _focal_flat_kernel(pred_ref, label_ref, sum_ref, cnt_ref, sum_acc, cnt_acc,
                       *, gamma, ignore_index, hw, tile_hw):
    t = pl.program_id(1)
    nt = pl.num_programs(1)

    @pl.when(t == 0)
    def _():
        sum_acc[...] = jnp.zeros_like(sum_acc)
        cnt_acc[...] = jnp.zeros_like(cnt_acc)

    x = pred_ref[0].astype(jnp.float32)                    # (C, T)
    labels = label_ref[0]                                  # (1, T)

    m = jnp.max(x, axis=0, keepdims=True)
    z = x - m
    lse = jnp.log(jnp.sum(jnp.exp(z), axis=0, keepdims=True))
    class_ids = lax.broadcasted_iota(jnp.int32, x.shape, 0)
    z_sel = jnp.sum(jnp.where(class_ids == labels, z, 0.0), axis=0, keepdims=True)
    log_pt = z_sel - lse

    col = lax.broadcasted_iota(jnp.int32, labels.shape, 1) + t * tile_hw
    valid = (labels != ignore_index) & (col < hw)

    ce = -log_pt
    pt = jnp.exp(log_pt)
    loss = jnp.where(valid, _focal_term(1.0 - pt, gamma) * ce, 0.0)

    sum_acc[...] += loss
    cnt_acc[...] += valid.astype(jnp.float32)

    @pl.when(t == nt - 1)
    def _():
        sum_ref[...] = jnp.sum(sum_acc[...]).reshape(1, 1, 1)
        cnt_ref[...] = jnp.sum(cnt_acc[...]).reshape(1, 1, 1)


def _focal_flat_call(pred3, mask3, *, gamma, ignore_index, block_bytes):
    b, c, hw = (int(d) for d in pred3.shape)
    itemsize = jnp.dtype(pred3.dtype).itemsize
    c_pad = ((c + 7) // 8) * 8                 # (C, T) block is sublane padded
    budget = min(int(block_bytes), 2 * 1024 * 1024)   # fallback: modest blocks
    cap = max(128, (budget // (c_pad * itemsize)) // 128 * 128)
    if hw <= cap:
        tile_hw, n_t = hw, 1
    else:
        tile_hw = cap
        n_t = pl.cdiv(hw, tile_hw)

    kernel = functools.partial(_focal_flat_kernel, gamma=float(gamma),
                               ignore_index=int(ignore_index), hw=hw,
                               tile_hw=tile_hw)

    part_sum, part_cnt = pl.pallas_call(
        kernel,
        out_shape=(jax.ShapeDtypeStruct((b, 1, 1), jnp.float32),
                   jax.ShapeDtypeStruct((b, 1, 1), jnp.float32)),
        grid_spec=pltpu.PrefetchScalarGridSpec(
            num_scalar_prefetch=0,
            grid=(b, n_t),
            in_specs=[pl.BlockSpec((1, c, tile_hw), lambda bi, ti: (bi, 0, ti)),
                      pl.BlockSpec((1, 1, tile_hw), lambda bi, ti: (bi, 0, ti))],
            out_specs=(pl.BlockSpec((1, 1, 1), lambda bi, ti: (bi, 0, 0)),
                       pl.BlockSpec((1, 1, 1), lambda bi, ti: (bi, 0, 0))),
            scratch_shapes=[pltpu.VMEM((1, tile_hw), jnp.float32),
                            pltpu.VMEM((1, tile_hw), jnp.float32)]),
        compiler_params=pltpu.CompilerParams(
            dimension_semantics=("parallel", "arbitrary"),
            vmem_limit_bytes=32 * 1024 * 1024),
    )(pred3, mask3)
    return jnp.sum(part_sum), jnp.sum(part_cnt)


# ---------------------------------------------------------------------------
# (N, C) classification path: (tile_n, C) blocking, no wrapper-side transpose.
# ---------------------------------------------------------------------------
def _focal_rows_kernel(pred_ref, label_ref, sum_ref, cnt_ref, *,
                       gamma, ignore_index, n_rows, tile_n, acc_rows,
                       need_row_mask):
    t = pl.program_id(0)

    @pl.when(t == 0)
    def _():
        sum_ref[...] = jnp.zeros_like(sum_ref)
        cnt_ref[...] = jnp.zeros_like(cnt_ref)

    x = pred_ref[...].astype(jnp.float32)                  # (Tn, C) classes on lanes
    y = label_ref[...]                                     # (Tn, 1)

    m = jnp.max(x, axis=-1, keepdims=True)
    z = x - m
    lse = jnp.log(jnp.sum(jnp.exp(z), axis=-1, keepdims=True))
    cls = lax.broadcasted_iota(jnp.int32, x.shape, 1)
    z_sel = jnp.sum(jnp.where(cls == y, z, 0.0), axis=-1, keepdims=True)
    log_pt = z_sel - lse                                   # (Tn, 1)

    valid = y != ignore_index
    if need_row_mask:
        row = lax.broadcasted_iota(jnp.int32, y.shape, 0) + t * tile_n
        valid = valid & (row < n_rows)

    ce = -log_pt
    pt = jnp.exp(log_pt)
    loss = jnp.where(valid, _focal_term(1.0 - pt, gamma) * ce, 0.0)
    validf = jnp.where(valid, 1.0, 0.0)

    ps, pc = loss, validf
    if tile_n != acc_rows:
        ps = loss[0:acc_rows]
        pc = validf[0:acc_rows]
        for q in range(1, tile_n // acc_rows):
            ps = ps + loss[q * acc_rows:(q + 1) * acc_rows]
            pc = pc + validf[q * acc_rows:(q + 1) * acc_rows]

    sum_ref[...] += ps
    cnt_ref[...] += pc


def _focal_rows_call(pred2, mask1, *, gamma, ignore_index, block_bytes):
    n, c = (int(d) for d in pred2.shape)
    mask2 = mask1.reshape(n, 1)

    c_pad = ((c + 127) // 128) * 128           # (Tn, C) block is lane padded
    tile_n = (block_bytes // (c_pad * 4)) // 8 * 8
    tile_n = max(8, min(tile_n, 8192))
    if tile_n >= n:
        tile_n, n_t = n, 1
    else:
        n_t = pl.cdiv(n, tile_n)
    acc_rows = 8 if tile_n % 8 == 0 else tile_n
    need_row_mask = (n_t * tile_n != n)

    kernel = functools.partial(_focal_rows_kernel, gamma=float(gamma),
                               ignore_index=int(ignore_index), n_rows=n,
                               tile_n=tile_n, acc_rows=acc_rows,
                               need_row_mask=need_row_mask)

    part_sum, part_cnt = pl.pallas_call(
        kernel,
        out_shape=(jax.ShapeDtypeStruct((acc_rows, 1), jnp.float32),
                   jax.ShapeDtypeStruct((acc_rows, 1), jnp.float32)),
        grid_spec=pltpu.PrefetchScalarGridSpec(
            num_scalar_prefetch=0,
            grid=(n_t,),
            in_specs=[pl.BlockSpec((tile_n, c), lambda t: (t, 0)),
                      pl.BlockSpec((tile_n, 1), lambda t: (t, 0))],
            out_specs=(pl.BlockSpec((acc_rows, 1), lambda t: (0, 0)),
                       pl.BlockSpec((acc_rows, 1), lambda t: (0, 0)))),
        compiler_params=pltpu.CompilerParams(
            dimension_semantics=("arbitrary",),
            vmem_limit_bytes=32 * 1024 * 1024),
    )(pred2, mask2)
    return jnp.sum(part_sum), jnp.sum(part_cnt)


# ---------------------------------------------------------------------------
# Public wrapper (matches FocalLoss.forward semantics).
# ---------------------------------------------------------------------------
def focal_loss(pred, mask, *, alpha=None, gamma=0.0, reduction="mean",
               ignore_index=-100, block_bytes=4 * 1024 * 1024):
    """Focal loss forward.  pred: (N, C) or (B, C, d1, ..., dK); mask: labels."""
    if reduction not in ("mean", "sum", "none"):
        raise ValueError('Reduction must be one of: "mean", "sum", "none".')
    if reduction == "none":
        # TODO(synk): reduction='none' returns a ragged (valid-rows-only) vector
        # in PyTorch; not expressible as a fixed-shape kernel output.
        raise NotImplementedError("reduction='none' not supported in this kernel")
    if alpha is not None:
        # TODO(synk): per-class alpha weights would scale `ce` by alpha[label] in-kernel.
        raise NotImplementedError("alpha (per-class weights) not supported")
    if pred.ndim < 2:
        raise ValueError("pred must be (N, C) or (B, C, d1, ..., dK)")

    if mask.dtype != jnp.int32:        # no-op for the common int32 case
        mask = mask.astype(jnp.int32)

    g = float(gamma)
    if pred.ndim == 2:
        loss_sum, cnt = _focal_rows_call(pred, mask, gamma=g,
                                         ignore_index=int(ignore_index),
                                         block_bytes=int(block_bytes))
    else:
        b, c = int(pred.shape[0]), int(pred.shape[1])
        hw = math.prod(int(d) for d in pred.shape[2:])
        if hw > 0 and hw % 128 == 0:
            pred4 = pred.reshape(b, c, hw // 128, 128)   # free: contiguous NC(HW)
            mask3 = mask.reshape(b, hw // 128, 128)
            loss_sum, cnt = _focal_dense_call(pred4, mask3, gamma=g,
                                              ignore_index=int(ignore_index),
                                              block_bytes=int(block_bytes))
        else:
            pred3 = pred.reshape(b, c, hw)
            mask3 = mask.reshape(b, 1, hw)
            loss_sum, cnt = _focal_flat_call(pred3, mask3, gamma=g,
                                             ignore_index=int(ignore_index),
                                             block_bytes=int(block_bytes))

    if reduction == "sum":
        return loss_sum
    # PyTorch module returns 0.0 when there are no un-ignored labels.
    return jnp.where(cnt > 0, loss_sum / jnp.maximum(cnt, 1.0), 0.0)


def _focal_loss_ref(pred, mask, *, gamma=0.0, reduction="mean", ignore_index=-100):
    """Pure-JAX reference for correctness checking."""
    if pred.ndim > 2:
        c = pred.shape[1]
        p = jnp.moveaxis(pred, 1, -1).reshape(-1, c).astype(jnp.float32)
        y = mask.reshape(-1).astype(jnp.int32)
    else:
        p = pred.astype(jnp.float32)
        y = mask.astype(jnp.int32)
    c = p.shape[-1]
    log_p = jax.nn.log_softmax(p, axis=-1)
    log_pt = jnp.take_along_axis(log_p, jnp.clip(y, 0, c - 1)[:, None], axis=-1)[:, 0]
    valid = (y != ignore_index).astype(jnp.float32)
    ce = -log_pt
    pt = jnp.exp(log_pt)
    loss = valid * ((1.0 - pt) ** gamma) * ce
    if reduction == "sum":
        return jnp.sum(loss)
    cnt = jnp.sum(valid)
    return jnp.where(cnt > 0, jnp.sum(loss) / jnp.maximum(cnt, 1.0), 0.0)


if __name__ == "__main__":
    key = jax.random.PRNGKey(0)
    ks = jax.random.split(key, 8)

    def check(out, ref, name):
        out = jax.block_until_ready(out)
        assert jnp.allclose(out, ref, rtol=1e-5, atol=1e-5), (name, out, ref)

    # 1) Dense path, single tile (HW = 256 = 2*128), gamma=2, batch parallel.
    B, C, H, W = 2, 4, 16, 16
    pred = jax.random.normal(ks[0], (B, C, H, W), dtype=jnp.float32)
    mask = jax.random.randint(ks[1], (B, H, W), 0, C, dtype=jnp.int32)
    mask = mask.at[0, 0, :5].set(-100)
    check(focal_loss(pred, mask, gamma=2.0),
          _focal_loss_ref(pred, mask, gamma=2.0), "dense-single")

    # 2) Dense path, multi-tile + core-split axis + ragged row tail (R=18, S=8).
    B2, C2, H2, W2 = 1, 5, 48, 48
    pred2 = jax.random.normal(ks[2], (B2, C2, H2, W2), dtype=jnp.float32)
    mask2 = jax.random.randint(ks[3], (B2, H2, W2), 0, C2, dtype=jnp.int32)
    mask2 = mask2.at[0, -1, :9].set(-100)
    check(focal_loss(pred2, mask2, gamma=2.0, block_bytes=8 * 1024),
          _focal_loss_ref(pred2, mask2, gamma=2.0), "dense-multi")

    # 3) Ragged-HW fallback (HW = 225), gamma=0 (module default), two tiles.
    B3, C3, H3, W3 = 2, 5, 15, 15
    pred3 = jax.random.normal(ks[4], (B3, C3, H3, W3), dtype=jnp.float32)
    mask3 = jax.random.randint(ks[5], (B3, H3, W3), 0, C3, dtype=jnp.int32)
    mask3 = mask3.at[1, -1, :7].set(-100)
    check(focal_loss(pred3, mask3, gamma=0.0, block_bytes=4096),
          _focal_loss_ref(pred3, mask3, gamma=0.0), "flat-ragged")

    # 4) (N, C) classification path, multi-tile, ragged rows, reduction='sum'.
    N4, C4 = 300, 7
    pred4 = jax.random.normal(ks[6], (N4, C4), dtype=jnp.float32)
    mask4 = jax.random.randint(ks[7], (N4,), 0, C4, dtype=jnp.int32)
    mask4 = mask4.at[:11].set(-100)
    check(focal_loss(pred4, mask4, gamma=2.0, reduction="sum", block_bytes=8 * 1024),
          _focal_loss_ref(pred4, mask4, gamma=2.0, reduction="sum"), "rows-2d")

    print("KERNEL_OK")
</pallas_src>

<mosaic_0001>
module attributes {stable_mosaic.version = 11 : i64} {
  func.func @_focal_dense_kernel(%arg0: i32, %arg1: i32, %arg2: i32, %arg3: memref<1x4x2x128xf32, #tpu.memory_space<vmem>>, %arg4: memref<1x2x128xi32, #tpu.memory_space<vmem>>, %arg5: memref<1x2x128xf32, #tpu.memory_space<vmem>>, %arg6: memref<1x2x128xf32, #tpu.memory_space<vmem>>) attributes {dimension_semantics = [#tpu.dimension_semantics<parallel>, #tpu.dimension_semantics<parallel>, #tpu.dimension_semantics<arbitrary>], iteration_bounds = array<i64: 2, 1, 1>, scalar_prefetch = 0 : i64, scratch_operands = 0 : i64, tpu.core_type = #tpu.core_type<tc>, window_params = [{transform_indices = @transform_0, window_bounds = array<i64: 1, 4, 2, 128>}, {transform_indices = @transform_1, window_bounds = array<i64: 1, 2, 128>}, {transform_indices = @transform_2, window_bounds = array<i64: 1, 2, 128>}, {transform_indices = @transform_3, window_bounds = array<i64: 1, 2, 128>}]} {
    %c0_i32 = arith.constant 0 : i32
    %0 = arith.cmpi eq, %arg2, %c0_i32 : i32
    %1 = arith.extui %0 : i1 to i32
    %c0_i32_0 = arith.constant 0 : i32
    %2 = arith.cmpi ne, %1, %c0_i32_0 : i32
    scf.if %2 {
      %cst_55 = arith.constant 0.000000e+00 : f32
      %87 = vector.broadcast %cst_55 : f32 to vector<1x2x128xf32>
      %c0_56 = arith.constant 0 : index
      %c0_57 = arith.constant 0 : index
      %c0_58 = arith.constant 0 : index
      %88 = vector.load %arg5[%c0_56, %c0_57, %c0_58] : memref<1x2x128xf32, #tpu.memory_space<vmem>>, vector<1x2x128xf32>
      tpu.vector_store %arg5[%c0_56, %c0_57, %c0_58], %87 {strides = array<i32>} : memref<1x2x128xf32, #tpu.memory_space<vmem>>, vector<1x2x128xf32>,
      %cst_59 = arith.constant 0.000000e+00 : f32
      %89 = vector.broadcast %cst_59 : f32 to vector<1x2x128xf32>
      %c0_60 = arith.constant 0 : index
      %c0_61 = arith.constant 0 : index
      %c0_62 = arith.constant 0 : index
      %90 = vector.load %arg6[%c0_60, %c0_61, %c0_62] : memref<1x2x128xf32, #tpu.memory_space<vmem>>, vector<1x2x128xf32>
      tpu.vector_store %arg6[%c0_60, %c0_61, %c0_62], %89 {strides = array<i32>} : memref<1x2x128xf32, #tpu.memory_space<vmem>>, vector<1x2x128xf32>,
    } else {
    }
    %c0 = arith.constant 0 : index
    %c0_1 = arith.constant 0 : index
    %c0_2 = arith.constant 0 : index
    %3 = vector.load %arg4[%c0, %c0_1, %c0_2] : memref<1x2x128xi32, #tpu.memory_space<vmem>>, vector<1x2x128xi32>
    %4 = vector.shape_cast %3 : vector<1x2x128xi32> to vector<2x128xi32>
    %c0_3 = arith.constant 0 : index
    %c0_4 = arith.constant 0 : index
    %c0_5 = arith.constant 0 : index
    %c0_6 = arith.constant 0 : index
    %5 = vector.load %arg3[%c0_3, %c0_4, %c0_5, %c0_6] : memref<1x4x2x128xf32, #tpu.memory_space<vmem>>, vector<1x1x2x128xf32>
    %6 = vector.shape_cast %5 : vector<1x1x2x128xf32> to vector<2x128xf32>
    %c0_7 = arith.constant 0 : index
    %c1 = arith.constant 1 : index
    %c0_8 = arith.constant 0 : index
    %c0_9 = arith.constant 0 : index
    %7 = vector.load %arg3[%c0_7, %c1, %c0_8, %c0_9] : memref<1x4x2x128xf32, #tpu.memory_space<vmem>>, vector<1x1x2x128xf32>
    %8 = vector.shape_cast %7 : vector<1x1x2x128xf32> to vector<2x128xf32>
    %9 = arith.maximumf %6, %8 : vector<2x128xf32>
    %c0_10 = arith.constant 0 : index
    %c2 = arith.constant 2 : index
    %c0_11 = arith.constant 0 : index
    %c0_12 = arith.constant 0 : index
    %10 = vector.load %arg3[%c0_10, %c2, %c0_11, %c0_12] : memref<1x4x2x128xf32, #tpu.memory_space<vmem>>, vector<1x1x2x128xf32>
    %11 = vector.shape_cast %10 : vector<1x1x2x128xf32> to vector<2x128xf32>
    %12 = arith.maximumf %9, %11 : vector<2x128xf32>
    %c0_13 = arith.constant 0 : index
    %c3 = arith.constant 3 : index
    %c0_14 = arith.constant 0 : index
    %c0_15 = arith.constant 0 : index
    %13 = vector.load %arg3[%c0_13, %c3, %c0_14, %c0_15] : memref<1x4x2x128xf32, #tpu.memory_space<vmem>>, vector<1x1x2x128xf32>
    %14 = vector.shape_cast %13 : vector<1x1x2x128xf32> to vector<2x128xf32>
    %15 = arith.maximumf %12, %14 : vector<2x128xf32>
    %cst = arith.constant 0.000000e+00 : f32
    %16 = vector.broadcast %cst : f32 to vector<2x128xf32>
    %cst_16 = arith.constant 0.000000e+00 : f32
    %17 = vector.broadcast %cst_16 : f32 to vector<2x128xf32>
    %c0_17 = arith.constant 0 : index
    %c0_18 = arith.constant 0 : index
    %c0_19 = arith.constant 0 : index
    %c0_20 = arith.constant 0 : index
    %18 = vector.load %arg3[%c0_17, %c0_18, %c0_19, %c0_20] : memref<1x4x2x128xf32, #tpu.memory_space<vmem>>, vector<1x1x2x128xf32>
    %19 = vector.shape_cast %18 : vector<1x1x2x128xf32> to vector<2x128xf32>
    %20 = arith.subf %19, %15 : vector<2x128xf32>
    %21 = math.exp %20 : vector<2x128xf32>
    %22 = arith.addf %16, %21 : vector<2x128xf32>
    %c0_i32_21 = arith.constant 0 : i32
    %23 = vector.broadcast %c0_i32_21 : i32 to vector<2x128xi32>
    %24 = arith.cmpi eq, %4, %23 : vector<2x128xi32>
    %cst_22 = arith.constant 0.000000e+00 : f32
    %25 = vector.broadcast %cst_22 : f32 to vector<2x128xf32>
    %26 = arith.select %24, %19, %25 : vector<2x128xi1>, vector<2x128xf32>
    %27 = arith.addf %17, %26 : vector<2x128xf32>
    %c0_23 = arith.constant 0 : index
    %c1_24 = arith.constant 1 : index
    %c0_25 = arith.constant 0 : index
    %c0_26 = arith.constant 0 : index
    %28 = vector.load %arg3[%c0_23, %c1_24, %c0_25, %c0_26] : memref<1x4x2x128xf32, #tpu.memory_space<vmem>>, vector<1x1x2x128xf32>
    %29 = vector.shape_cast %28 : vector<1x1x2x128xf32> to vector<2x128xf32>
    %30 = arith.subf %29, %15 : vector<2x128xf32>
    %31 = math.exp %30 : vector<2x128xf32>
    %32 = arith.addf %22, %31 : vector<2x128xf32>
    %c1_i32 = arith.constant 1 : i32
    %33 = vector.broadcast %c1_i32 : i32 to vector<2x128xi32>
    %34 = arith.cmpi eq, %4, %33 : vector<2x128xi32>
    %cst_27 = arith.constant 0.000000e+00 : f32
    %35 = vector.broadcast %cst_27 : f32 to vector<2x128xf32>
    %36 = arith.select %34, %29, %35 : vector<2x128xi1>, vector<2x128xf32>
    %37 = arith.addf %27, %36 : vector<2x128xf32>
    %c0_28 = arith.constant 0 : index
    %c2_29 = arith.constant 2 : index
    %c0_30 = arith.constant 0 : index
    %c0_31 = arith.constant 0 : index
    %38 = vector.load %arg3[%c0_28, %c2_29, %c0_30, %c0_31] : memref<1x4x2x128xf32, #tpu.memory_space<vmem>>, vector<1x1x2x128xf32>
    %39 = vector.shape_cast %38 : vector<1x1x2x128xf32> to vector<2x128xf32>
    %40 = arith.subf %39, %15 : vector<2x128xf32>
    %41 = math.exp %40 : vector<2x128xf32>
    %42 = arith.addf %32, %41 : vector<2x128xf32>
    %c2_i32 = arith.constant 2 : i32
    %43 = vector.broadcast %c2_i32 : i32 to vector<2x128xi32>
    %44 = arith.cmpi eq, %4, %43 : vector<2x128xi32>
    %cst_32 = arith.constant 0.000000e+00 : f32
    %45 = vector.broadcast %cst_32 : f32 to vector<2x128xf32>
    %46 = arith.select %44, %39, %45 : vector<2x128xi1>, vector<2x128xf32>
    %47 = arith.addf %37, %46 : vector<2x128xf32>
    %c0_33 = arith.constant 0 : index
    %c3_34 = arith.constant 3 : index
    %c0_35 = arith.constant 0 : index
    %c0_36 = arith.constant 0 : index
    %48 = vector.load %arg3[%c0_33, %c3_34, %c0_35, %c0_36] : memref<1x4x2x128xf32, #tpu.memory_space<vmem>>, vector<1x1x2x128xf32>
    %49 = vector.shape_cast %48 : vector<1x1x2x128xf32> to vector<2x128xf32>
    %50 = arith.subf %49, %15 : vector<2x128xf32>
    %51 = math.exp %50 : vector<2x128xf32>
    %52 = arith.addf %42, %51 : vector<2x128xf32>
    %c3_i32 = arith.constant 3 : i32
    %53 = vector.broadcast %c3_i32 : i32 to vector<2x128xi32>
    %54 = arith.cmpi eq, %4, %53 : vector<2x128xi32>
    %cst_37 = arith.constant 0.000000e+00 : f32
    %55 = vector.broadcast %cst_37 : f32 to vector<2x128xf32>
    %56 = arith.select %54, %49, %55 : vector<2x128xi1>, vector<2x128xf32>
    %57 = arith.addf %47, %56 : vector<2x128xf32>
    %58 = arith.subf %57, %15 : vector<2x128xf32>
    %59 = math.log %52 : vector<2x128xf32>
    %60 = arith.subf %58, %59 : vector<2x128xf32>
    %c-100_i32 = arith.constant -100 : i32
    %61 = vector.broadcast %c-100_i32 : i32 to vector<2x128xi32>
    %62 = arith.cmpi ne, %4, %61 : vector<2x128xi32>
    %cst_38 = arith.constant 0.000000e+00 : f32
    %63 = vector.broadcast %cst_38 : f32 to vector<2x128xf32>
    %64 = arith.subf %63, %60 : vector<2x128xf32>
    %65 = math.exp %60 : vector<2x128xf32>
    %cst_39 = arith.constant 1.000000e+00 : f32
    %66 = vector.broadcast %cst_39 : f32 to vector<2x128xf32>
    %67 = arith.subf %66, %65 : vector<2x128xf32>
    %68 = arith.mulf %67, %67 : vector<2x128xf32>
    %69 = arith.mulf %68, %64 : vector<2x128xf32>
    %cst_40 = arith.constant 0.000000e+00 : f32
    %70 = vector.broadcast %cst_40 : f32 to vector<2x128xf32>
    %71 = arith.select %62, %69, %70 : vector<2x128xi1>, vector<2x128xf32>
    %cst_41 = arith.constant 1.000000e+00 : f32
    %cst_42 = arith.constant 0.000000e+00 : f32
    %72 = vector.broadcast %cst_41 : f32 to vector<2x128xf32>
    %73 = vector.broadcast %cst_42 : f32 to vector<2x128xf32>
    %74 = arith.select %62, %72, %73 : vector<2x128xi1>, vector<2x128xf32>
    %c0_43 = arith.constant 0 : index
    %c0_44 = arith.constant 0 : index
    %c0_45 = arith.constant 0 : index
    %75 = vector.load %arg5[%c0_43, %c0_44, %c0_45] : memref<1x2x128xf32, #tpu.memory_space<vmem>>, vector<1x2x128xf32>
    %76 = vector.shape_cast %75 : vector<1x2x128xf32> to vector<2x128xf32>
    %77 = arith.addf %76, %71 : vector<2x128xf32>
    %c0_46 = arith.constant 0 : index
    %c0_47 = arith.constant 0 : index
    %c0_48 = arith.constant 0 : index
    %78 = vector.load %arg5[%c0_46, %c0_47, %c0_48] : memref<1x2x128xf32, #tpu.memory_space<vmem>>, vector<1x2x128xf32>
    %79 = vector.shape_cast %78 : vector<1x2x128xf32> to vector<2x128xf32>
    %80 = vector.shape_cast %77 : vector<2x128xf32> to vector<1x2x128xf32>
    tpu.vector_store %arg5[%c0_46, %c0_47, %c0_48], %80 {strides = array<i32>} : memref<1x2x128xf32, #tpu.memory_space<vmem>>, vector<1x2x128xf32>,
    %c0_49 = arith.constant 0 : index
    %c0_50 = arith.constant 0 : index
    %c0_51 = arith.constant 0 : index
    %81 = vector.load %arg6[%c0_49, %c0_50, %c0_51] : memref<1x2x128xf32, #tpu.memory_space<vmem>>, vector<1x2x128xf32>
    %82 = vector.shape_cast %81 : vector<1x2x128xf32> to vector<2x128xf32>
    %83 = arith.addf %82, %74 : vector<2x128xf32>
    %c0_52 = arith.constant 0 : index
    %c0_53 = arith.constant 0 : index
    %c0_54 = arith.constant 0 : index
    %84 = vector.load %arg6[%c0_52, %c0_53, %c0_54] : memref<1x2x128xf32, #tpu.memory_space<vmem>>, vector<1x2x128xf32>
    %85 = vector.shape_cast %84 : vector<1x2x128xf32> to vector<2x128xf32>
    %86 = vector.shape_cast %83 : vector<2x128xf32> to vector<1x2x128xf32>
    tpu.vector_store %arg6[%c0_52, %c0_53, %c0_54], %86 {strides = array<i32>} : memref<1x2x128xf32, #tpu.memory_space<vmem>>, vector<1x2x128xf32>,
    return
  }
  func.func @transform_0(%arg0: i32, %arg1: i32, %arg2: i32) -> (i32, i32, i32, i32) {
    %c1_i32 = arith.constant 1 : i32
    %0 = arith.muli %arg1, %c1_i32 : i32
    %1 = arith.addi %0, %arg2 : i32
    %c0_i32 = arith.constant 0 : i32
    %2 = arith.minsi %1, %c0_i32 : i32
    %c0_i32_0 = arith.constant 0 : i32
    %c0_i32_1 = arith.constant 0 : i32
    %c0_i32_2 = arith.constant 0 : i32
    return %arg0, %c0_i32_0, %2, %c0_i32_1 : i32, i32, i32, i32
  }
  func.func @transform_1(%arg0: i32, %arg1: i32, %arg2: i32) -> (i32, i32, i32) {
    %c1_i32 = arith.constant 1 : i32
    %0 = arith.muli %arg1, %c1_i32 : i32
    %1 = arith.addi %0, %arg2 : i32
    %c0_i32 = arith.constant 0 : i32
    %2 = arith.minsi %1, %c0_i32 : i32
    %c0_i32_0 = arith.constant 0 : i32
    %c0_i32_1 = arith.constant 0 : i32
    return %arg0, %2, %c0_i32_0 : i32, i32, i32
  }
  func.func @transform_2(%arg0: i32, %arg1: i32, %arg2: i32) -> (i32, i32, i32) {
    %c1_i32 = arith.constant 1 : i32
    %0 = arith.muli %arg0, %c1_i32 : i32
    %1 = arith.addi %0, %arg1 : i32
    %c0_i32 = arith.constant 0 : i32
    %c0_i32_0 = arith.constant 0 : i32
    %c0_i32_1 = arith.constant 0 : i32
    return %1, %c0_i32, %c0_i32_0 : i32, i32, i32
  }
  func.func @transform_3(%arg0: i32, %arg1: i32, %arg2: i32) -> (i32, i32, i32) {
    %c1_i32 = arith.constant 1 : i32
    %0 = arith.muli %arg0, %c1_i32 : i32
    %1 = arith.addi %0, %arg1 : i32
    %c0_i32 = arith.constant 0 : i32
    %c0_i32_0 = arith.constant 0 : i32
    %c0_i32_1 = arith.constant 0 : i32
    return %1, %c0_i32, %c0_i32_0 : i32, i32, i32
  }
}

</mosaic_0001>

<bundles_post_ra>
// kernel: tpu_custom_call.1
= control target key start
LH: loop header
LB: loop body
LE: loop exit
PB: predicated region body
PF: predicated region fallthrough
CT: control target
= control target key end

     0   :  { %9 = vsyncpa [#allocation3], 0  ;;  %s1032_s0 = inlined_call_operand.hbm [shape: f32[2,4,2,128], index: 0, kind: input, shape index: {}]   ;;  %s1033_s1 = inlined_call_operand.hbm [shape: s32[2,2,128], index: 1, kind: input, shape index: {}]   ;;  %s1034_s2 = inlined_call_operand.hbm [shape: f32[2,2,128], index: 2, kind: output, shape index: {0}]   ;;  %s1035_s3 = inlined_call_operand.hbm [shape: f32[2,2,128], index: 3, kind: output, shape index: {1}]  }
   0x1   :  { %11 = vsyncpa [#allocation3 + $0x1], 0 }
   0x2   :  { %12 = vsyncpa [#allocation6], 0 }
   0x3   :  { %14 = vsyncpa [#allocation6 + $0x1], 0 }
   0x4   :  { %15 = vsyncpa [#allocation4], 0 }
   0x5   :  { %17 = vsyncpa [#allocation4 + $0x1], 0 }
   0x6   :  { %18 = vsyncpa [#allocation9], 0 }
   0x7   :  { %20 = vsyncpa [#allocation9 + $0x1], 0  ;;  %s853_s12 = smov 0   ;;  %s855_s13 = smov 0  }
   0x8   :  { %s857_s14 = smov 0   ;;  %s859_s15 = smov 0  }
   0x9   :  { %s861_s16 = smov 0   ;;  %s863_s17 = smov 0  }
   0xa LB: > { %s539_s18 = sadd.s32 4294967295, %s828_s17   ;;  %s540_s19 = sadd.s32 4294967294, %s828_s17   ;;  %s828_s17 = sphi %s863_s17, %s26_s17   ;;  %s824_s16 = sphi %s861_s16, %s1045_s16   ;;  %s820_s15 = sphi %s859_s15, %s1044_s15   ;;  %s816_s14 = sphi %s857_s14, %s1043_s14   ;;  %s812_s13 = sphi %s855_s13, %s1042_s13   ;;  %s808_s12 = sphi %s853_s12, %s1041_s12  }
   0xb   : > { %s45_s20 = sadd.s32 1, %s824_s16  ;;  %s60_s21 = sadd.s32 1, %s816_s14 }
   0xc   : > { %p47_p0 = scmp.ge.s32.totalorder %s45_s20, 2  ;;  %p67_p1 = scmp.ne.s32.totalorder %s816_s14, %s812_s13 }
   0xd   : > { %p68_p2 = scmp.eq.s32.totalorder %s828_s17, 0  ;;  %p73_p3 = scmp.ne.s32.totalorder %s812_s13, %s808_s12 }
   0xe   : > { %s1047_s20 = smov (%p47_p0, %s45_s20), 0  ;;  %p74_p5 = scmp.eq.s32.totalorder %s539_s18, 0 }
   0xf   : > { %p894_p4 = por %p68_p2, %p67_p1  ;;  %s55_s23 = ssub.s32 %s824_s16, %s1047_s20 }
  0x10   : > { %p133_p6 = scmp.eq.s32.totalorder %s539_s18, 1  ;;  %p58_p7 = scmp.eq.s32.totalorder %s55_s23, 0 }
  0x11   : > { %p900_p8 = por %p74_p5, %p73_p3  ;;  %p139_p10 = scmp.eq.s32.totalorder %s540_s19, 1 }
  0x12   : > { %p904_p9 = por %p133_p6, %p67_p1  ;;  %p542_p12 = scmp.ge.s32.totalorder %s828_s17, 2 }
  0x13   : > { %s909_s26 = scalar_select %p58_p7, %s816_s14, %s60_s21  }
  0x14   : > { %p911_p11 = por %p139_p10, %p73_p3  ;;  %p585_p13 = scmp.lt.s32.totalorder %s828_s17, 2 }
  0x15   : > { %s187_s28 = sand.u32 1, %s816_s14   ;;  %s562_s30 = sshll.u32 %s824_s16, 3 }
  0x16   : > { %s543_s29 = sshll.u32 %s187_s28, 3  ;;  %s200_s6 = scalar_lea.hbm %s1032_s0, %s562_s30 }
  0x17   : > { %s191_s7 = scalar_lea.vmem [#allocation2], %s543_s29  ;;  %s201_s9 = sshll.u32 %s200_s6, 4  ;;  %s202_s9 = int_to_ptr.hbm [resolvable:$true] %s201_s9 }
  0x18   : > { %s203_s8 = sshll.u32 %s191_s7, 4  ;;  %p924_p0 = pnand %p585_p13, %p894_p4  ;;  %s204_s8 = int_to_ptr.vmem [resolvable:$true] %s203_s8 }
  0x19   : > { %p548_p1 = scmp.ge.s32.totalorder %s828_s17, 1  ;;  %s188_s11 = scalar_lea.sflag [#allocation3], %s187_s28 }
  0x1a   : > { %s830_s18 = smov 32   ;;  %s831_s19 = smov 2  }
  0x1b   : > { %574 = dma.hbm_to_vmem [thread:$0]  (!%p924_p0), %s202_s9, 128, %s204_s8, %s188_s11, %s830_s18, %s830_s18, %s831_s19  }
  0x1c   : > { %p234_p2 = scmp.lt.s32.totalorder %s828_s17, 3  ;;  %s546_s21 = sshll.u32 %s187_s28, 1 }
  0x1d   : > { %s547_s23 = sshll.u32 %s824_s16, 1  ;;  %s217_s4 = scalar_lea.vmem [#allocation5], %s546_s21 }
  0x1e   : > { %p235_p3 = pnand %p548_p1, %p234_p2  ;;  %s225_s22 = scalar_lea.hbm %s1033_s1, %s547_s23 }
  0x1f   : > { %s229_s5 = sshll.u32 %s217_s4, 4  ;;  %s227_s6 = sshll.u32 %s225_s22, 4  ;;  %s230_s5 = int_to_ptr.vmem [resolvable:$true] %s229_s5  ;;  %s228_s6 = int_to_ptr.hbm [resolvable:$true] %s227_s6 }
  0x20   : > { %s214_s7 = scalar_lea.sflag [#allocation6], %s187_s28  ;;  %238 = sbr.rel (%p235_p3) target bundleno = 99 (0x63), region = 28 }
  0x21   : > { %577 = dma.hbm_to_vmem [thread:$0]  (!%p924_p0), %s228_s6, 32, %s230_s5, %s214_s7  }
  0x22   : > { %s939_s8 = sand.u32 (!%p235_p3), 1, %s812_s13  }
  0x23   : > { %s549_s9 = sshll.u32 (!%p235_p3), %s939_s8, 3  ;;  %s241_s11 = scalar_lea.sflag (!%p235_p3), [#allocation3], %s939_s8 }
  0x24   : > { %s244_s18 = scalar_lea.vmem (!%p235_p3), [#allocation2], %s549_s9 }
  0x25   : > { %791 = dma.done.wait (%p900_p8), %s241_s11, 128  }
  0x26   : > { %793 = vsyncadd (%p900_p8), %s241_s11, 4294967168  ;;  %s550_s28 = sshll.u32 %s939_s8, 1  ;;  %s251_s10 = scalar_lea.sflag [#allocation6], %s939_s8 }
  0x27   : > { %s254_s19 = scalar_lea.vmem [#allocation5], %s550_s28 }
  0x28   : > { %795 = dma.done.wait (%p900_p8), %s251_s10, 32  }
  0x29   : > { %797 = vsyncadd (%p900_p8), %s251_s10, 4294967264  ;;  %s953_s21 = scalar_lea.vmem [#allocation7], %s550_s28  ;;  %v832_v0 = vmov 0.0   ;;  %s956_s23 = scalar_lea.vmem [#allocation8], %s550_s28  ;;  %v303_v1 = vld [vmem:[%s244_s18] sm:$0x3] }
  0x2a   : > { %300 = vst [vmem:[%s953_s21] sm:$0x3] %v832_v0  ;;  %v553_v2 = vld [vmem:[%s244_s18 + $0x2] sm:$0x3]  ;;  %v554_v4 = vld [vmem:[%s244_s18 + $0x4] sm:$0x3]  ;;  %s558_s24 = sshll.u32 %s820_s15, 1 }
  0x2b   : > { %301 = vst [vmem:[%s956_s23] sm:$0x3] %v832_v0  ;;  %v306_v3 = vmax.f32 %v303_v1, %v553_v2  ;;  %v555_v5 = vld [vmem:[%s244_s18 + $0x6] sm:$0x3]  ;;  %v959_v12 = vld [vmem:[%s254_s19] sm:$0x3]  ;;  %s392_s22 = scalar_lea.hbm %s1035_s3, %s558_s24  ;;  %s394_s4 = sshll.u32 %s956_s23, 4  ;;  %s395_s4 = int_to_ptr.vmem [resolvable:$true] %s394_s4 }
  0x2c   : > { %vm317_vm0 = vcmp.eq.s32.totalorder %v959_v12, 0  ;;  %vm324_vm1 = vcmp.eq.s32.totalorder %v959_v12, 1  ;;  %vm331_vm2 = vcmp.eq.s32.totalorder %v959_v12, 2  ;;  %vm345_vm3 = vcmp.ne.s32.totalorder %v959_v12, 4294967196  ;;  %s396_s5 = sshll.u32 %s392_s22, 4  ;;  %s366_s6 = scalar_lea.sflag [#allocation9], %s939_s8  ;;  %s397_s5 = int_to_ptr.hbm [resolvable:$true] %s396_s5 }
  0x2d   : > { %v309_v6 = vmax.f32 %v306_v3, %v554_v4  ;;  %v318_v17 = vsel %vm317_vm0, %v303_v1, 0.0  ;;  %v325_v18 = vsel %vm324_vm1, %v553_v2, 0.0  ;;  %v332_v24 = vsel %vm331_vm2, %v554_v4, 0.0  ;;  %s724_s7 = sshra.s32 %s397_s5, 4  ;;  %s730_s28 = scalar_lea.hbm %s1035_s3, 4  ;;  %s725_s7 = int_to_ptr.hbm [resolvable:$true] %s724_s7 }
  0x2e   : > { %v326_v21 = vadd.f32 %v325_v18, %v318_v17  ;;  %v353_v25 = vsel %vm345_vm3, 1.0, %v832_v0  ;;  %vm338_vm4 = vcmp.eq.s32.totalorder %v959_v12, 3  ;;  %s726_s9 = scalar_lea.hbm %s725_s7, 2  ;;  %p731_p7 = scmp.lt.s32.totalorder %s725_s7, %s1035_s3 }
  0x2f   : > { %v312_v7 = vmax.f32 %v309_v6, %v555_v5  ;;  %v339_v32 = vsel %vm338_vm4, %v555_v5, 0.0  ;;  %p727_p4 = scmp.ne.s32.totalorder %s725_s7, %s726_s9  ;;  %p732_p8 = scmp.lt.s32.totalorder %s730_s28, %s726_s9 }
  0x30   : > { %v333_v30 = vadd.f32 %v332_v24, %v326_v21 }
  0x31   : > { %v313_v8 = vsub.f32 %v303_v1, %v312_v7  ;;  %v320_v9 = vsub.f32 %v553_v2, %v312_v7  ;;  %v327_v10 = vsub.f32 %v554_v4, %v312_v7  ;;  %v334_v11 = vsub.f32 %v555_v5, %v312_v7  ;;  %p728_p5 = pnand %p727_p4, %p904_p9  ;;  %p733_p10 = por %p732_p8, %p731_p7 }
  0x32   : > { %v357_v26 = vld [vmem:[%s956_s23] sm:$0x3] }
  0x33   : > { %v314_v13 = vmul.f32 1.442695, %v313_v8  ;;  %v321_v14 = vmul.f32 1.442695, %v320_v9  ;;  %v328_v15 = vmul.f32 1.442695, %v327_v10  ;;  %v358_v28 = vadd.f32 %v357_v26, %v353_v25  ;;  %p729_p6 = pneg %p728_p5 }
  0x34   : > { %v335_v16 = vmul.f32 1.442695, %v334_v11 }
  0x35   : > { %638 = vpow2.f32 %v314_v13  ;;  %359 = vst [vmem:[%s956_s23] sm:$0x3] %v358_v28  ;;  %p734_p13 = pnand %p733_p10, %p729_p6 }
  0x36   : > { %640 = vpow2.f32 %v321_v14 }
  0x37   : > { %642 = vpow2.f32 %v328_v15 }
  0x38   : > { %644 = vpow2.f32 %v335_v16 }
  0x3b   : > { %v639_v19 = vpop.eup %638 }
  0x3c   : > { %v641_v20 = vpop.eup %640 }
  0x3d   : > { %v643_v22 = vpop.eup %642  ;;  %v323_v23 = vadd.f32 %v641_v20, %v639_v19 }
  0x3e   : > { %v645_v27 = vpop.eup %644 }
  0x3f   : > { %v330_v29 = vadd.f32 %v643_v22, %v323_v23 }
  0x41   : > { %v337_v31 = vadd.f32 %v645_v27, %v330_v29 }
  0x42   : > { %737 = shalt.err (!%p734_p13)
}
  0x43   : > { %568 = dma.vmem_to_hbm [thread:$0]  (%p904_p9), %s395_s4, 32, %s397_s5, %s366_s6   ;;  %646 = vlog2.f32 %v337_v31  ;;  %v340_v33 = vadd.f32 %v339_v32, %v333_v30  ;;  %v354_v44 = vld [vmem:[%s953_s21] sm:$0x3] }
  0x44   : > { %s377_s30 = scalar_lea.hbm %s1034_s2, %s558_s24  ;;  %s379_s22 = sshll.u32 %s953_s21, 4  ;;  %s380_s22 = int_to_ptr.vmem [resolvable:$true] %s379_s22 }
  0x45   : > { %v341_v34 = vsub.f32 %v340_v33, %v312_v7  ;;  %s381_s4 = sshll.u32 %s377_s30, 4  ;;  %s361_s5 = scalar_lea.sflag [#allocation4], %s939_s8  ;;  %s382_s4 = int_to_ptr.hbm [resolvable:$true] %s381_s4 }
  0x46   : > { %s752_s6 = sshra.s32 %s382_s4, 4  ;;  %s758_s9 = scalar_lea.hbm %s1034_s2, 4  ;;  %s753_s6 = int_to_ptr.hbm [resolvable:$true] %s752_s6 }
  0x47   : > { %s754_s15 = scalar_lea.hbm %s753_s6, 2  ;;  %p759_p3 = scmp.lt.s32.totalorder %s753_s6, %s1034_s2 }
  0x48   : > { %p755_p0 = scmp.ne.s32.totalorder %s753_s6, %s754_s15  ;;  %p760_p4 = scmp.lt.s32.totalorder %s758_s9, %s754_s15 }
  0x49   : > { %v647_v35 = vpop.eup %646 }
  0x4a   : > { %v343_v36 = vmul.f32 0.6931472, %v647_v35  ;;  %p756_p1 = pnand %p755_p0, %p904_p9  ;;  %p761_p5 = por %p760_p4, %p759_p3 }
  0x4c   : > { %v344_v37 = vsub.f32 %v341_v34, %v343_v36  ;;  %p757_p2 = pneg %p756_p1 }
  0x4e   : > { %v347_v38 = vmul.f32 1.442695, %v344_v37  ;;  %v346_v40 = vsub.f32 0.0, %v344_v37  ;;  %p762_p6 = pnand %p761_p5, %p757_p2 }
  0x50   : > { %648 = vpow2.f32 %v347_v38 }
  0x56   : > { %v649_v39 = vpop.eup %648 }
  0x57   : > { %v349_v41 = vsub.f32 1.0, %v649_v39 }
  0x59   : > { %v350_v42 = vmul.f32 %v349_v41, %v349_v41 }
  0x5b   : > { %v351_v43 = vmul.f32 %v350_v42, %v346_v40 }
  0x5d   : > { %v352_v45 = vsel %vm345_vm3, %v351_v43, 0.0 }
  0x5e   : > { %v355_v46 = vadd.f32 %v354_v44, %v352_v45 }
  0x60   : > { %356 = vst [vmem:[%s953_s21] sm:$0x3] %v355_v46 }
  0x61   : > { %765 = shalt.err (!%p762_p6)
}
  0x62   : > { %567 = dma.vmem_to_hbm [thread:$0]  (%p904_p9), %s380_s22, 32, %s382_s4, %s361_s5  }
  0x63 PF: > { %s408_s8 = sand.u32 1, %s808_s12   ;;  %p579_p7 = pnand %p542_p12, %p911_p11 }
  0x64   : > { %s409_s21 = scalar_lea.sflag [#allocation4], %s408_s8 }
  0x65   : > { %p580_p8 = pneg %p579_p7 }
  0x67   : > { %799 = dma.done.wait (%p580_p8), %s409_s21, 32  }
  0x68   : > { %801 = vsyncadd (%p580_p8), %s409_s21, 4294967264  ;;  %s419_s28 = scalar_lea.sflag [#allocation9], %s408_s8 }
  0x69   : > { %803 = dma.done.wait (%p580_p8), %s419_s28, 32  }
  0x6a   : > { %805 = vsyncadd (%p580_p8), %s419_s28, 4294967264  ;;  %s26_s17 = sadd.s32 1, %s828_s17   ;;  %s1041_s12 = smov %s812_s13 }
  0x6b   : > { %p23_p10 = scmp.ge.s32.totalorder %s26_s17, 4   ;;  %s1042_s13 = smov %s816_s14 }
  0x6c   : > { %s1043_s14 = smov %s909_s26  ;;  %s1044_s15 = smov %s824_s16 }
  0x6d   : > { %s1045_s16 = smov %s1047_s20  ;;  %25 = sbr.rel (!%p23_p10) target bundleno = 10 (0xa), region = 110 }
  0x72   :  { %425 = vsyncpa [#allocation3], 1 }
  0x73   :  { %427 = vsyncpa [#allocation3 + $0x1], 1 }
  0x74   :  { %428 = vsyncpa [#allocation6], 1 }
  0x75   :  { %430 = vsyncpa [#allocation6 + $0x1], 1 }
  0x76   :  { %431 = vsyncpa [#allocation4], 1 }
  0x77   :  { %433 = vsyncpa [#allocation4 + $0x1], 1 }
  0x78   :  { %434 = vsyncpa [#allocation9], 1 }
  0x79   :  { %436 = vsyncpa [#allocation9 + $0x1], 1 }

</bundles_post_ra>
